<compile_context>
chip_gen: v5e
topology: v5e:2x2
jax: 0.10.0
libtpu: 0.0.40
codegen_flags: <defaults>
</compile_context>

<pallas_src>
import jax
import jax.numpy as jnp
from jax.experimental import pallas as pl
from jax.experimental.pallas import tpu as pltpu


def _se_kernel(x_ref, w1_ref, b1_ref, w2_ref, b2_ref, o_ref):
    # x_ref/o_ref: (Nb, C, HW)
    # w1_ref: (C, Cs)  b1_ref: (1, Cs)   (conv_reduce, pre-transposed)
    # w2_ref: (Cs, C)  b2_ref: (1, C)    (conv_expand, pre-transposed)
    x = x_ref[...]                                          # (Nb, C, HW) in input dtype

    # squeeze: global average pool over spatial dims (accumulate in f32)
    s = jnp.mean(x, axis=2, dtype=jnp.float32)              # (Nb, C)

    # conv_reduce (1x1 conv == matmul) + bias, then SiLU
    h = jnp.dot(s, w1_ref[...],
                preferred_element_type=jnp.float32) + b1_ref[...]   # (Nb, Cs)
    h = h * jax.nn.sigmoid(h)

    # conv_expand (1x1 conv == matmul) + bias, then Sigmoid
    e = jnp.dot(h, w2_ref[...],
                preferred_element_type=jnp.float32) + b2_ref[...]   # (Nb, C)
    e = jax.nn.sigmoid(e).astype(x.dtype)

    # excite: broadcast per-channel scale over spatial positions
    o_ref[...] = e[:, :, None] * x


def _pick_batch_block(N, C, HW, itemsize, vmem_budget_bytes):
    """Largest Nb (dividing N) whose double-buffered in+out tiles fit the budget,
    while keeping the grid >= 2 steps when N >= 2 (v7x megacore sharding)."""
    per_batch = C * HW * itemsize
    # 2 buffers (pipelining) x (input + output) per block.
    max_nb = max(1, vmem_budget_bytes // (4 * per_batch))
    nb = min(N, max_nb)
    if N >= 2:
        nb = min(nb, max(1, (N + 1) // 2))   # leave at least 2 grid steps
    while N % nb:
        nb -= 1
    return nb


def squeeze_excite(x, w_reduce, b_reduce, w_expand, b_expand):
    """x: (N, C, H, W) NCHW.  w_reduce: (Cs, C), w_expand: (C, Cs)."""
    N, C, H, W = x.shape
    HW = H * W
    Cs = w_reduce.shape[0]

    xf = x.reshape(N, C, HW)
    # Pre-transpose weights once in the wrapper (no in-kernel XLU transpose).
    w1t = jnp.transpose(w_reduce)            # (C, Cs)
    w2t = jnp.transpose(w_expand)            # (Cs, C)
    b1 = b_reduce.reshape(1, Cs)
    b2 = b_expand.reshape(1, C)

    # Conservative VMEM budget (fits the 32 MiB scoped default on v6e/v7x and
    # is covered explicitly via vmem_limit_bytes on v5e's 16 MiB default).
    vmem_budget = 24 * 1024 * 1024
    nb = _pick_batch_block(N, C, HW, xf.dtype.itemsize, vmem_budget)
    grid = (N // nb,)

    out = pl.pallas_call(
        _se_kernel,
        out_shape=jax.ShapeDtypeStruct((N, C, HW), x.dtype),
        grid=grid,
        in_specs=[
            pl.BlockSpec((nb, C, HW), lambda n: (n, 0, 0)),  # x: Nb batches / step
            pl.BlockSpec((C, Cs),     lambda n: (0, 0)),     # conv_reduce weight^T
            pl.BlockSpec((1, Cs),     lambda n: (0, 0)),     # conv_reduce bias
            pl.BlockSpec((Cs, C),     lambda n: (0, 0)),     # conv_expand weight^T
            pl.BlockSpec((1, C),      lambda n: (0, 0)),     # conv_expand bias
        ],
        out_specs=pl.BlockSpec((nb, C, HW), lambda n: (n, 0, 0)),
        input_output_aliases={0: 0},         # x aliased to output (same shape/dtype)
        compiler_params=pltpu.CompilerParams(
            dimension_semantics=("parallel",),
            vmem_limit_bytes=32 * 1024 * 1024),
    )(xf, w1t, b1, w2t, b2)

    return out.reshape(N, C, H, W)


def _reference(x, w_reduce, b_reduce, w_expand, b_expand):
    # pure-JAX reference mirroring the PyTorch forward
    s = jnp.mean(x, axis=(2, 3), keepdims=True)                       # (N,C,1,1)
    s = jnp.einsum('nchw,oc->nohw', s, w_reduce) + b_reduce[None, :, None, None]
    s = s * jax.nn.sigmoid(s)                                         # SiLU
    s = jnp.einsum('nchw,oc->nohw', s, w_expand) + b_expand[None, :, None, None]
    s = jax.nn.sigmoid(s)
    return s * x


if __name__ == "__main__":
    # Module config: input_c=16, expand_c=16, se_ratio=0.25 -> squeeze_c=4
    input_c, expand_c, se_ratio = 16, 16, 0.25
    squeeze_c = int(input_c * se_ratio)

    N, C, H, W = 2, expand_c, 16, 16

    key = jax.random.PRNGKey(0)
    kx, k1, k2, k3, k4 = jax.random.split(key, 5)

    x = jax.random.normal(kx, (N, C, H, W), dtype=jnp.float32)

    # Deterministic parameter init (PyTorch Conv2d-style uniform bounds).
    bound1 = 1.0 / (expand_c ** 0.5)
    w_reduce = jax.random.uniform(k1, (squeeze_c, expand_c), jnp.float32,
                                  -bound1, bound1)
    b_reduce = jax.random.uniform(k2, (squeeze_c,), jnp.float32, -bound1, bound1)

    bound2 = 1.0 / (squeeze_c ** 0.5)
    w_expand = jax.random.uniform(k3, (expand_c, squeeze_c), jnp.float32,
                                  -bound2, bound2)
    b_expand = jax.random.uniform(k4, (expand_c,), jnp.float32, -bound2, bound2)

    # Compute the reference first (the kernel aliases x to its output).
    ref = _reference(x, w_reduce, b_reduce, w_expand, b_expand)
    ref = jax.block_until_ready(ref)

    out = squeeze_excite(x, w_reduce, b_reduce, w_expand, b_expand)
    out = jax.block_until_ready(out)

    assert out.shape == (N, C, H, W)
    assert jnp.allclose(out, ref, atol=1e-5, rtol=1e-5), "mismatch vs reference"

    print("KERNEL_OK")
</pallas_src>

<mosaic_0001>
module attributes {stable_mosaic.version = 11 : i64} {
  func.func @_se_kernel(%arg0: i32, %arg1: memref<1x16x256xf32, #tpu.memory_space<vmem>>, %arg2: memref<16x4xf32, #tpu.memory_space<vmem>>, %arg3: memref<1x4xf32, #tpu.memory_space<vmem>>, %arg4: memref<4x16xf32, #tpu.memory_space<vmem>>, %arg5: memref<1x16xf32, #tpu.memory_space<vmem>>, %arg6: memref<1x16x256xf32, #tpu.memory_space<vmem>>) attributes {dimension_semantics = [#tpu.dimension_semantics<parallel>], iteration_bounds = array<i64: 2>, scalar_prefetch = 0 : i64, scratch_operands = 0 : i64, tpu.core_type = #tpu.core_type<tc>, window_params = [{transform_indices = @transform_0, window_bounds = array<i64: 1, 16, 256>}, {pipeline_mode = #tpu.pipeline_mode<synchronous>, transform_indices = @transform_1, window_bounds = array<i64: 16, 4>}, {pipeline_mode = #tpu.pipeline_mode<synchronous>, transform_indices = @transform_2, window_bounds = array<i64: 1, 4>}, {pipeline_mode = #tpu.pipeline_mode<synchronous>, transform_indices = @transform_3, window_bounds = array<i64: 4, 16>}, {pipeline_mode = #tpu.pipeline_mode<synchronous>, transform_indices = @transform_4, window_bounds = array<i64: 1, 16>}, {transform_indices = @transform_5, window_bounds = array<i64: 1, 16, 256>}]} {
    %c0 = arith.constant 0 : index
    %c0_0 = arith.constant 0 : index
    %c0_1 = arith.constant 0 : index
    %0 = vector.load %arg1[%c0, %c0_0, %c0_1] : memref<1x16x256xf32, #tpu.memory_space<vmem>>, vector<1x16x256xf32>
    %cst = arith.constant dense<0.000000e+00> : vector<1x16xf32>
    %1 = vector.multi_reduction <add>, %0, %cst [2] : vector<1x16x256xf32> to vector<1x16xf32>
    %cst_2 = arith.constant 2.560000e+02 : f32
    %2 = vector.broadcast %cst_2 : f32 to vector<1x16xf32>
    %3 = arith.divf %1, %2 : vector<1x16xf32>
    %c0_3 = arith.constant 0 : index
    %c0_4 = arith.constant 0 : index
    %4 = vector.load %arg2[%c0_3, %c0_4] : memref<16x4xf32, #tpu.memory_space<vmem>>, vector<16x4xf32>
    %cst_5 = arith.constant dense<0.000000e+00> : vector<1x4xf32>
    %5 = tpu.matmul %3, %4, %cst_5 {dimension_numbers = #tpu.dot_dimension_numbers<[1], [0], [0], [1], [0, 0, 1, 1], [], []>} : vector<1x16xf32>, vector<16x4xf32>, vector<1x4xf32> -> vector<1x4xf32>
    %c0_6 = arith.constant 0 : index
    %c0_7 = arith.constant 0 : index
    %6 = vector.load %arg3[%c0_6, %c0_7] : memref<1x4xf32, #tpu.memory_space<vmem>>, vector<1x4xf32>
    %7 = arith.addf %5, %6 : vector<1x4xf32>
    %8 = arith.negf %7 : vector<1x4xf32>
    %9 = math.exp %8 : vector<1x4xf32>
    %cst_8 = arith.constant 1.000000e+00 : f32
    %10 = vector.broadcast %cst_8 : f32 to vector<1x4xf32>
    %11 = arith.addf %10, %9 : vector<1x4xf32>
    %12 = arith.divf %10, %11 : vector<1x4xf32>
    %13 = arith.mulf %7, %12 : vector<1x4xf32>
    %c0_9 = arith.constant 0 : index
    %c0_10 = arith.constant 0 : index
    %14 = vector.load %arg4[%c0_9, %c0_10] : memref<4x16xf32, #tpu.memory_space<vmem>>, vector<4x16xf32>
    %cst_11 = arith.constant dense<0.000000e+00> : vector<1x16xf32>
    %15 = tpu.matmul %13, %14, %cst_11 {dimension_numbers = #tpu.dot_dimension_numbers<[1], [0], [0], [1], [0, 0, 1, 1], [], []>} : vector<1x4xf32>, vector<4x16xf32>, vector<1x16xf32> -> vector<1x16xf32>
    %c0_12 = arith.constant 0 : index
    %c0_13 = arith.constant 0 : index
    %16 = vector.load %arg5[%c0_12, %c0_13] : memref<1x16xf32, #tpu.memory_space<vmem>>, vector<1x16xf32>
    %17 = arith.addf %15, %16 : vector<1x16xf32>
    %18 = arith.negf %17 : vector<1x16xf32>
    %19 = math.exp %18 : vector<1x16xf32>
    %cst_14 = arith.constant 1.000000e+00 : f32
    %20 = vector.broadcast %cst_14 : f32 to vector<1x16xf32>
    %21 = arith.addf %20, %19 : vector<1x16xf32>
    %22 = arith.divf %20, %21 : vector<1x16xf32>
    %23 = vector.shape_cast %22 : vector<1x16xf32> to vector<1x16x1xf32>
    %24 = vector.broadcast %23 : vector<1x16x1xf32> to vector<1x16x256xf32>
    %25 = arith.mulf %24, %0 : vector<1x16x256xf32>
    %c0_15 = arith.constant 0 : index
    %c0_16 = arith.constant 0 : index
    %c0_17 = arith.constant 0 : index
    %26 = vector.load %arg6[%c0_15, %c0_16, %c0_17] : memref<1x16x256xf32, #tpu.memory_space<vmem>>, vector<1x16x256xf32>
    tpu.vector_store %arg6[%c0_15, %c0_16, %c0_17], %25 {strides = array<i32>} : memref<1x16x256xf32, #tpu.memory_space<vmem>>, vector<1x16x256xf32>,
    return
  }
  func.func @transform_0(%arg0: i32) -> (i32, i32, i32) {
    %c0_i32 = arith.constant 0 : i32
    %c0_i32_0 = arith.constant 0 : i32
    %c0_i32_1 = arith.constant 0 : i32
    return %arg0, %c0_i32, %c0_i32_0 : i32, i32, i32
  }
  func.func @transform_1(%arg0: i32) -> (i32, i32) {
    %c0_i32 = arith.constant 0 : i32
    %c0_i32_0 = arith.constant 0 : i32
    %c0_i32_1 = arith.constant 0 : i32
    return %c0_i32, %c0_i32_0 : i32, i32
  }
  func.func @transform_2(%arg0: i32) -> (i32, i32) {
    %c0_i32 = arith.constant 0 : i32
    %c0_i32_0 = arith.constant 0 : i32
    %c0_i32_1 = arith.constant 0 : i32
    return %c0_i32, %c0_i32_0 : i32, i32
  }
  func.func @transform_3(%arg0: i32) -> (i32, i32) {
    %c0_i32 = arith.constant 0 : i32
    %c0_i32_0 = arith.constant 0 : i32
    %c0_i32_1 = arith.constant 0 : i32
    return %c0_i32, %c0_i32_0 : i32, i32
  }
  func.func @transform_4(%arg0: i32) -> (i32, i32) {
    %c0_i32 = arith.constant 0 : i32
    %c0_i32_0 = arith.constant 0 : i32
    %c0_i32_1 = arith.constant 0 : i32
    return %c0_i32, %c0_i32_0 : i32, i32
  }
  func.func @transform_5(%arg0: i32) -> (i32, i32, i32) {
    %c0_i32 = arith.constant 0 : i32
    %c0_i32_0 = arith.constant 0 : i32
    %c0_i32_1 = arith.constant 0 : i32
    return %arg0, %c0_i32, %c0_i32_0 : i32, i32, i32
  }
}

</mosaic_0001>

<bundles_post_ra>
// kernel: tpu_custom_call.1
= control target key start
LH: loop header
LB: loop body
LE: loop exit
PB: predicated region body
PF: predicated region fallthrough
CT: control target
= control target key end

     0   :  { %10 = vsyncpa [#allocation3], 0  ;;  %s858_s0 = inlined_call_operand.hbm [shape: f32[2,16,256], index: 0, kind: input, shape index: {}, may-alias: {0,5}]   ;;  %s859_s1 = inlined_call_operand.vmem [shape: f32[16,4], index: 1, kind: input, shape index: {}]   ;;  %s860_s2 = inlined_call_operand.vmem [shape: f32[1,4], index: 2, kind: input, shape index: {}]   ;;  %s861_s3 = inlined_call_operand.vmem [shape: f32[4,16], index: 3, kind: input, shape index: {}]   ;;  %s862_s4 = inlined_call_operand.vmem [shape: f32[1,16], index: 4, kind: input, shape index: {}]   ;;  %s863_s5 = inlined_call_operand.hbm [shape: f32[2,16,256], index: 5, kind: output, shape index: {}, may-alias: {0,5}]  }
   0x1   :  { %12 = vsyncpa [#allocation3 + $0x1], 0 }
   0x2   :  { %13 = vsyncpa [#allocation4], 0 }
   0x3   :  { %15 = vsyncpa [#allocation4 + $0x1], 0  ;;  %s696_s18 = smov 0   ;;  %s698_s19 = smov 0  }
   0x4   :  { %s700_s20 = smov 0   ;;  %s702_s21 = smov 0  }
   0x5 LB: > { %s717_s22 = sadd.s32 4294967295, %s659_s21   ;;  %s478_s23 = sadd.s32 4294967294, %s659_s21   ;;  %s659_s21 = sphi %s702_s21, %s873_s21   ;;  %s655_s20 = sphi %s700_s20, %s872_s20   ;;  %s651_s19 = sphi %s698_s19, %s871_s19   ;;  %s647_s18 = sphi %s696_s18, %s870_s18  }
   0x6   : > { %s721_s24 = sadd.s32 1, %s659_s21   ;;  %s28_s25 = sadd.s32 1, %s655_s20 }
   0x7   : > { %s25_s26 = ssub.s32 %s659_s21, %s721_s24  ;;  %p35_p0 = scmp.ne.s32.totalorder %s655_s20, %s651_s19 }
   0x8   : > { %p26_p1 = scmp.eq.s32.totalorder %s25_s26, 0  ;;  %p36_p2 = scmp.eq.s32.totalorder %s659_s21, 0 }
   0x9   : > { %p41_p3 = scmp.ne.s32.totalorder %s651_s19, %s647_s18  ;;  %p42_p4 = scmp.eq.s32.totalorder %s717_s22, 0 }
   0xa   : > { %s733_s27 = scalar_select %p26_p1, %s655_s20, %s28_s25  }
   0xb   : > { %p735_p5 = por %p36_p2, %p35_p0  ;;  %p739_p6 = por %p42_p4, %p41_p3 }
   0xc   : > { %p149_p7 = scmp.eq.s32.totalorder %s717_s22, 1  ;;  %p155_p8 = scmp.eq.s32.totalorder %s478_s23, 1 }
   0xd   : > { %p511_p10 = scmp.lt.s32.totalorder %s659_s21, 2  ;;  %s187_s7 = sand.u32 1, %s655_s20  }
   0xe   : > { %p746_p11 = por %p149_p7, %p35_p0  ;;  %p750_p12 = por %p155_p8, %p41_p3 }
   0xf   : > { %s497_s8 = sshll.u32 %s659_s21, 5  ;;  %s481_s9 = sshll.u32 %s187_s7, 5 }
  0x10   : > { %s196_s12 = scalar_lea.hbm %s858_s0, %s497_s8  ;;  %s191_s14 = scalar_lea.vmem [#allocation2], %s481_s9 }
  0x11   : > { %s197_s13 = sshll.u32 %s196_s12, 4  ;;  %s199_s15 = sshll.u32 %s191_s14, 4  ;;  %s198_s13 = int_to_ptr.hbm [resolvable:$true] %s197_s13  ;;  %s200_s15 = int_to_ptr.vmem [resolvable:$true] %s199_s15 }
  0x12   : > { %p761_p13 = pnand %p511_p10, %p735_p5  ;;  %p484_p0 = scmp.ge.s32.totalorder %s659_s21, 1 }
  0x13   : > { %p207_p1 = scmp.lt.s32.totalorder %s659_s21, 3  ;;  %s188_s17 = scalar_lea.sflag [#allocation3], %s187_s7 }
  0x14   : > { %s563_s23 = sshra.s32 %s198_s13, 4  ;;  %p567_p3 = pneg %p761_p13  ;;  %s564_s23 = int_to_ptr.hbm [resolvable:$true] %s563_s23 }
  0x15   : > { %s565_s25 = scalar_lea.hbm %s564_s23, 32  ;;  %s570_s28 = scalar_lea.hbm %s858_s0, 64 }
  0x16   : > { %p566_p2 = scmp.ne.s32.totalorder %s564_s23, %s565_s25  ;;  %p571_p5 = scmp.lt.s32.totalorder %s564_s23, %s858_s0 }
  0x17   : > { %p572_p8 = scmp.lt.s32.totalorder %s570_s28, %s565_s25 }
  0x18   : > { %p568_p4 = pnand %p567_p3, %p566_p2 }
  0x19   : > { %p573_p10 = por %p572_p8, %p571_p5 }
  0x1a   : > { %p569_p7 = pneg %p568_p4 }
  0x1c   : > { %p574_p9 = pnand %p573_p10, %p569_p7 }
  0x1e   : > { %577 = shalt.err (!%p574_p9)
}
  0x1f   : > { %s661_s7 = smov 256   ;;  %s662_s11 = smov 16  }
  0x20   : > { %506 = dma.hbm_to_vmem [thread:$0]  (!%p761_p13), %s198_s13, 512, %s200_s15, %s188_s17, %s661_s7, %s661_s7, %s662_s11  }
  0x21   : > { %p208_p2 = pnand %p484_p0, %p207_p1 }
  0x22   : > { %s782_s12 = sand.u32 (!%p208_p2), 1, %s651_s19  }
  0x23   : > { %211 = sbr.rel (%p208_p2) target bundleno = 627 (0x273), region = 40  ;;  %s485_s14 = sshll.u32 (!%p208_p2), %s782_s12, 5 }
  0x24   : > { %s214_s23 = scalar_lea.sflag (!%p208_p2), [#allocation3], %s782_s12  ;;  %s217_s25 = scalar_lea.vmem (!%p208_p2), [#allocation2], %s485_s14 }
  0x28   : > { %638 = dma.done.wait (%p739_p6), %s214_s23, 512  }
  0x29   : > { %640 = vsyncadd (%p739_p6), %s214_s23, 4294966784  ;;  %v792_v0 = vld [vmem:[%s217_s25] sm:$0xff]  ;;  %v794_v1 = vld [vmem:[%s217_s25 + $0x8] sm:$0xff]  ;;  %v663_v7 = vmov 256.0   ;;  %v269_v15 = vlaneseq  ;;  %vm274_vm1 = vcmask 130112   ;;  %vm276_vm2 = vcmask 130048  }
  0x2a   : > { %v249_v2 = vadd.f32 %v794_v1, %v792_v0  ;;  %v798_v3 = vld [vmem:[%s217_s25 + $0x10] sm:$0xff]  ;;  %v800_v4 = vld [vmem:[%s217_s25 + $0x18] sm:$0xff]  ;;  %v265_v6 = vld [vmem:[%s859_s1 + $0x8] sm:$0xff]  ;;  %553 = vrcp.f32 %v663_v7  ;;  %vm325_vm3 = vcmask 1043456   ;;  %vm321_vm8 = vcmask 31744   ;;  %s244_s7 = scalar_lea.vmem [#allocation5], %s485_s14 }
  0x2b   : > { %v252_v5 = vadd.f32 %v800_v4, %v798_v3  ;;  %293 = vmatpush.msra.mxu0 %v265_v6  ;;  %v264_v8 = vld [vmem:[%s859_s1] sm:$0xff]  ;;  %v270_v17 = vand.u32 127, %v269_v15  ;;  %v370_v43 = vshrl.u32 %v269_v15, 7  ;;  %s498_s11 = sshll.u32 %s717_s22, 5  ;;  %s402_s15 = sshll.u32 %s244_s7, 4  ;;  %s403_s15 = int_to_ptr.vmem [resolvable:$true] %s402_s15 }
  0x2c   : > { %250 = vadd.xlane.f32.xlu0 %v249_v2  ;;  %v266_v25 = vld [vmem:[%s860_s2] sm:$0x1]  ;;  %s401_s13 = scalar_lea.hbm %s863_s5, %s498_s11  ;;  %s390_s14 = scalar_lea.sflag [#allocation4], %s782_s12 }
  0x2d   : > { %294 = vmatpush.msra.mxu0 %v264_v8  ;;  %v272_v19 = vadd.s32 4294967288, %v270_v17  ;;  %v319_v26 = vld [vmem:[%s861_s3] sm:$0xf]  ;;  %550 = vset.pattern.permute.xlu1 %v370_v43  ;;  %v377_v44 = vadd.s32 8, %v370_v43  ;;  %s404_s29 = sshll.u32 %s401_s13, 4  ;;  %s613_s8 = scalar_lea.hbm %s863_s5, 64  ;;  %s405_s29 = int_to_ptr.hbm [resolvable:$true] %s404_s29 }
  0x2e   : > { %489 = vmatpush.msk.msra.mxu1 %vm325_vm3, %v319_v26  ;;  %v320_v45 = vld [vmem:[%s862_s4] sm:$0x1]  ;;  %s607_s16 = sshra.s32 %s405_s29, 4  ;;  %s608_s16 = int_to_ptr.hbm [resolvable:$true] %s607_s16 }
  0x2f   : > { %552 = vset.pattern.permute.xlu0 %v377_v44  ;;  %s609_s22 = scalar_lea.hbm %s608_s16, 32  ;;  %p614_p0 = scmp.lt.s32.totalorder %s608_s16, %s863_s5 }
  0x30   : > { %v554_v9 = vpop.eup %553  ;;  %p610_p6 = scmp.ne.s32.totalorder %s608_s16, %s609_s22  ;;  %p615_p1 = scmp.lt.s32.totalorder %s613_s8, %s609_s22 }
  0x31   : > { %v256_v10 = vmul.f32 256.0, %v554_v9  ;;  %vm260_vm0 = vweird.f32 %v554_v9 }
  0x32   : > { %p611_p9 = pnand %p610_p6, %p746_p11  ;;  %p616_p3 = por %p615_p1, %p614_p0 }
  0x33   : > { %v257_v11 = vsub.f32 1.0, %v256_v10 }
  0x34   : > { %253 = vadd.xlane.f32.xlu0 %v252_v5  ;;  %p612_p13 = pneg %p611_p9 }
  0x35   : > { %v258_v12 = vmul.f32 %v554_v9, %v257_v11 }
  0x36   : > { %p617_p4 = pnand %p616_p3, %p612_p13 }
  0x37   : > { %v259_v13 = vadd.f32 %v554_v9, %v258_v12 }
  0x39   : > { %v261_v16 = vsel %vm260_vm0, %v554_v9, %v259_v13 }
  0x9f   : > { %v251_v14 = vpop.xlane.xlu0 %250 }
  0xa0   : > { %v262_v18 = vmul.f32 %v261_v16, %v251_v14 }
  0xa2   : > { %v271_v22 = vperm.slane %v262_v18, %v270_v17 }
  0xa7   : > { %v254_v20 = vpop.xlane.xlu0 %253 }
  0xa8   : > { %v263_v21 = vmul.f32 %v261_v16, %v254_v20 }
  0xaa   : > { %v273_v23 = vperm.slane %v263_v21, %v272_v19 }
  0xac   : > { %v275_v24 = vsel %vm274_vm1, %v273_v23, %v271_v22 }
  0xad   : > { %487 = vmatmul.msk.f32.vlgmr.msra.gmra.mxu0 %vm276_vm2, %v275_v24 }
 0x12a   : > { %v296_v27 = vpop.f32.mrf.mxu0 }
 0x12b   : > { %v297_v28 = vadd.f32 %v296_v27, %v266_v25 }
 0x12d   : > { %v488_v29 = vmul.f32 -1.442695, %v297_v28 }
 0x12f   : > { %555 = vpow2.f32 %v488_v29 }
 0x135   : > { %v556_v30 = vpop.eup %555 }
 0x136   : > { %v302_v31 = vadd.f32 1.0, %v556_v30 }
 0x138   : > { %557 = vrcp.f32 %v302_v31  ;;  %v314_v35 = vand.u32 2147483648, %v302_v31  ;;  %v312_v37 = vand.u32 2147483647, %v302_v31  ;;  %vm308_vm5 = vweird.f32 %v302_v31 }
 0x13a   : > { %v315_v39 = vor.u32 1.1754944e-38, %v314_v35  ;;  %vm313_vm7 = vcmp.eq.f32.partialorder %v312_v37, 8.507059e+37 }
 0x13e   : > { %v558_v32 = vpop.eup %557 }
 0x13f   : > { %v304_v33 = vmul.f32 %v558_v32, %v302_v31  ;;  %vm309_vm4 = vweird.f32 %v558_v32 }
 0x140   : > { %vm310_vm6 = vmor %vm308_vm5, %vm309_vm4 }
 0x141   : > { %v305_v34 = vsub.f32 1.0, %v304_v33 }
 0x143   : > { %v306_v36 = vmul.f32 %v558_v32, %v305_v34 }
 0x145   : > { %v307_v38 = vadd.f32 %v558_v32, %v306_v36 }
 0x147   : > { %v311_v40 = vsel %vm310_vm6, %v558_v32, %v307_v38 }
 0x148   : > { %v316_v41 = vsel %vm313_vm7, %v315_v39, %v311_v40 }
 0x149   : > { %v318_v42 = vmul.f32 %v316_v41, %v297_v28 }
 0x14b   : > { %490 = vmatmul.msk.f32.vlgmr.msra.gmra.mxu1 %vm321_vm8, %v318_v42 }
 0x1c8   : > { %v346_v46 = vpop.f32.mrf.mxu1 }
 0x1c9   : > { %v347_v47 = vadd.f32 %v346_v46, %v320_v45 }
 0x1cb   : > { %v491_v48 = vmul.f32 -1.442695, %v347_v47 }
 0x1cd   : > { %559 = vpow2.f32 %v491_v48 }
 0x1d3   : > { %v560_v49 = vpop.eup %559 }
 0x1d4   : > { %v352_v50 = vadd.f32 1.0, %v560_v49 }
 0x1d6   : > { %561 = vrcp.f32 %v352_v50  ;;  %v364_v54 = vand.u32 2147483648, %v352_v50  ;;  %v362_v56 = vand.u32 2147483647, %v352_v50  ;;  %vm358_vm10 = vweird.f32 %v352_v50 }
 0x1d8   : > { %v365_v58 = vor.u32 1.1754944e-38, %v364_v54  ;;  %vm363_vm12 = vcmp.eq.f32.partialorder %v362_v56, 8.507059e+37 }
 0x1dc   : > { %v562_v51 = vpop.eup %561 }
 0x1dd   : > { %v354_v52 = vmul.f32 %v562_v51, %v352_v50  ;;  %vm359_vm9 = vweird.f32 %v562_v51 }
 0x1de   : > { %vm360_vm11 = vmor %vm358_vm10, %vm359_vm9 }
 0x1df   : > { %v355_v53 = vsub.f32 1.0, %v354_v52 }
 0x1e1   : > { %v356_v55 = vmul.f32 %v562_v51, %v355_v53 }
 0x1e3   : > { %v357_v57 = vadd.f32 %v562_v51, %v356_v55 }
 0x1e5   : > { %v361_v59 = vsel %vm360_vm11, %v562_v51, %v357_v57 }
 0x1e6   : > { %v366_v60 = vsel %vm363_vm12, %v365_v58, %v361_v59 }
 0x1e7   : > { %v368_v61 = vperm.slane %v366_v60, 0 }
 0x1e9   : > { %373 = vperm.xlu1 %550, %v368_v61  }
 0x1f1   : > { %551 = vset.pattern.permute.xlu1 %v377_v44 }
 0x1f9   : > { %379 = vperm.xlu1 %551, %v368_v61  }
 0x25b   : > { %v374_v62 = vpop.permute.xlu1 %373 }
 0x25c   : > { %v381_v63 = vmul.f32 %v374_v62, %v792_v0  ;;  %v382_v2 = vmul.f32 %v374_v62, %v794_v1 }
 0x25e   : > { %385 = vst [vmem:[%s244_s7] sm:$0xff] %v381_v63 }
 0x25f   : > { %386 = vst [vmem:[%s244_s7 + $0x8] sm:$0xff] %v382_v2 }
 0x26b   : > { %v380_v5 = vpop.permute.xlu1 %379 }
 0x26c   : > { %v383_v6 = vmul.f32 %v380_v5, %v798_v3  ;;  %v384_v0 = vmul.f32 %v380_v5, %v800_v4 }
 0x26e   : > { %387 = vst [vmem:[%s244_s7 + $0x10] sm:$0xff] %v383_v6 }
 0x26f   : > { %388 = vst [vmem:[%s244_s7 + $0x18] sm:$0xff] %v384_v0 }
 0x270   : > { %620 = shalt.err (!%p617_p4)
}
 0x271   : > { %s664_s12 = smov 256   ;;  %s665_s10 = smov 16  }
 0x272   : > { %501 = dma.vmem_to_hbm [thread:$0]  (%p746_p11), %s403_s15, 512, %s405_s29, %s390_s14, %s664_s12, %s664_s12, %s665_s10  }
 0x273 PF: > { %s419_s7 = sand.u32 1, %s647_s18   ;;  %p869_p7 = scmp.ge.s32.totalorder %s659_s21, 2 }
 0x274   : > { %s420_s11 = scalar_lea.sflag [#allocation4], %s419_s7 }
 0x275   : > { %p508_p5 = pnand %p869_p7, %p750_p12 }
 0x277   : > { %p509_p8 = pneg %p508_p5 }
 0x279   : > { %642 = dma.done.wait (%p509_p8), %s420_s11, 512  }
 0x27a   : > { %644 = vsyncadd (%p509_p8), %s420_s11, 4294966784  ;;  %p18_p10 = scmp.ge.s32.totalorder %s721_s24, 4   ;;  %s870_s18 = smov %s651_s19 }
 0x27b   : > { %s871_s19 = smov %s655_s20  ;;  %s872_s20 = smov %s733_s27 }
 0x27c   : > { %s873_s21 = smov %s721_s24  ;;  %20 = sbr.rel (!%p18_p10) target bundleno = 5 (0x5), region = 85 }
 0x281   :  { %426 = vsyncpa [#allocation3], 1 }
 0x282   :  { %428 = vsyncpa [#allocation3 + $0x1], 1 }
 0x283   :  { %429 = vsyncpa [#allocation4], 1 }
 0x284   :  { %431 = vsyncpa [#allocation4 + $0x1], 1 }

</bundles_post_ra>
